<compile_context>
chip_gen: v7x
topology: tpu7x:2x2x1
jax: 0.10.0
libtpu: 0.0.40
codegen_flags: <defaults>
</compile_context>

<pallas_src>
import jax
import jax.numpy as jnp
from jax import lax
from jax.experimental import pallas as pl
from jax.experimental.pallas import tpu as pltpu

_LANE = 128


def _round_up(x: int, m: int) -> int:
    return ((x + m - 1) // m) * m


def _rep_task_kernel(x_ref, w1_ref, b1_ref, w2_ref, b2_ref, out_ref):
    # x_ref  : [TM, D_in]          native dtype (f32 or bf16)
    # w1_ref : [H, D_in]           PyTorch [out, in] layout (embedding weight)
    # b1_ref : [1, H]              f32 (epilogue stays f32 on the accumulator)
    # w2_ref : [O_pad, H]          PyTorch [out, in] layout, lane-padded to 128
    # b2_ref : [1, O_pad]          f32
    # out_ref: [TM, O_pad]
    x = x_ref[...]
    w1 = w1_ref[...]
    w2 = w2_ref[...]

    # embedding_model: h = x @ w1.T + b1 ; ReLU.  Contract last dims (NT matmul
    # on the MXU, no materialized transpose); accumulate in f32.
    h = lax.dot_general(x, w1, (((1,), (1,)), ((), ())),
                        preferred_element_type=jnp.float32)
    h = jnp.maximum(h + b1_ref[...], 0.0)          # f32 epilogue

    # head: logits = h @ w2.T + b2 ; feed the MXU in the weight's native dtype.
    h = h.astype(w2.dtype)
    logits = lax.dot_general(h, w2, (((1,), (1,)), ((), ())),
                             preferred_element_type=jnp.float32)
    logits = logits + b2_ref[...]

    out_ref[...] = logits.astype(out_ref.dtype)


def rep_task_forward(x, w_emb, b_emb, w_head, b_head, *, max_tm=512):
    """x: [B, D_in]; w_emb: [H, D_in]; b_emb: [H]; w_head: [O, H]; b_head: [O].

    Weights are in PyTorch nn.Linear [out, in] layout and are NOT transposed;
    the kernel contracts over the last dims directly.
    """
    B, D_in = x.shape
    H = w_emb.shape[0]
    O = w_head.shape[0]

    # Lane-dense output: pad the head's out-dim up to a multiple of 128.
    O_pad = _round_up(max(O, _LANE), _LANE)

    # Batch tile: multiple of 8 sublanes, capped at max_tm; pad B to a multiple.
    TM = min(max_tm, _round_up(B, 8))
    B_pad = _round_up(B, TM)
    x_p = x if B_pad == B else jnp.pad(x, ((0, B_pad - B), (0, 0)))

    # Parameter prep (glue): no transposes; zero-pad head rows; biases to f32.
    w1 = w_emb                                               # [H, D_in]
    b1 = b_emb.astype(jnp.float32).reshape(1, H)             # [1, H]
    w2 = jnp.pad(w_head, ((0, O_pad - O), (0, 0)))           # [O_pad, H]
    b2 = jnp.pad(b_head, (0, O_pad - O)).astype(jnp.float32).reshape(1, O_pad)

    grid = (B_pad // TM,)

    flops = 2 * B_pad * (D_in * H + H * O_pad)
    bytes_accessed = (x_p.size * x_p.dtype.itemsize
                      + w1.size * w1.dtype.itemsize
                      + w2.size * w2.dtype.itemsize
                      + b1.size * 4 + b2.size * 4
                      + B_pad * O_pad * x.dtype.itemsize)

    out = pl.pallas_call(
        _rep_task_kernel,
        out_shape=jax.ShapeDtypeStruct((B_pad, O_pad), x.dtype),
        grid=grid,
        in_specs=[
            pl.BlockSpec((TM, D_in), lambda i: (i, 0)),   # x: tiled over batch
            pl.BlockSpec((H, D_in), lambda i: (0, 0)),    # w1: VMEM-resident
            pl.BlockSpec((1, H), lambda i: (0, 0)),       # b1: VMEM-resident
            pl.BlockSpec((O_pad, H), lambda i: (0, 0)),   # w2: VMEM-resident
            pl.BlockSpec((1, O_pad), lambda i: (0, 0)),   # b2: VMEM-resident
        ],
        out_specs=pl.BlockSpec((TM, O_pad), lambda i: (i, 0)),
        compiler_params=pltpu.CompilerParams(
            dimension_semantics=("parallel",)),
        cost_estimate=pl.CostEstimate(flops=flops, transcendentals=0,
                                      bytes_accessed=bytes_accessed),
    )(x_p, w1, b1, w2, b2)

    # Strip batch + lane padding.
    return out[:B, :O]


def _reference_forward(x, w_emb, b_emb, w_head, b_head):
    """Pure-JAX reference mirroring the PyTorch semantics."""
    embs = jnp.maximum(x @ w_emb.T + b_emb, 0.0)
    return embs @ w_head.T + b_head


if __name__ == "__main__":
    # Small shapes consistent with the module's forward:
    #   X: [batch, input_dim] -> embedding_model -> [batch, hidden_dim]
    #   -> Linear(hidden_dim, output_dim) -> [batch, output_dim]
    batch, input_dim, hidden_dim, output_dim = 8, 32, 32, 16

    key = jax.random.PRNGKey(0)
    k_x, k_w1, k_b1, k_w2, k_b2 = jax.random.split(key, 5)

    x = jax.random.normal(k_x, (batch, input_dim), dtype=jnp.float32)

    # Deterministic parameter init (PyTorch nn.Linear-style uniform bounds).
    bound1 = 1.0 / jnp.sqrt(input_dim)
    w_emb = jax.random.uniform(k_w1, (hidden_dim, input_dim), jnp.float32,
                               -bound1, bound1)
    b_emb = jax.random.uniform(k_b1, (hidden_dim,), jnp.float32,
                               -bound1, bound1)

    bound2 = 1.0 / jnp.sqrt(hidden_dim)
    w_head = jax.random.uniform(k_w2, (output_dim, hidden_dim), jnp.float32,
                                -bound2, bound2)
    b_head = jax.random.uniform(k_b2, (output_dim,), jnp.float32,
                                -bound2, bound2)

    logits = rep_task_forward(x, w_emb, b_emb, w_head, b_head)
    logits = jax.block_until_ready(logits)

    ref = _reference_forward(x, w_emb, b_emb, w_head, b_head)
    assert logits.shape == (batch, output_dim)
    assert jnp.allclose(logits, ref, atol=1e-4, rtol=1e-4), "mismatch vs reference"

    print("KERNEL_OK")
</pallas_src>

<mosaic_0001>
module attributes {stable_mosaic.version = 11 : i64} {
  func.func @_rep_task_kernel(%arg0: i32, %arg1: memref<8x32xf32, #tpu.memory_space<vmem>>, %arg2: memref<32x32xf32, #tpu.memory_space<vmem>>, %arg3: memref<1x32xf32, #tpu.memory_space<vmem>>, %arg4: memref<128x32xf32, #tpu.memory_space<vmem>>, %arg5: memref<1x128xf32, #tpu.memory_space<vmem>>, %arg6: memref<8x128xf32, #tpu.memory_space<vmem>>) attributes {dimension_semantics = [#tpu.dimension_semantics<parallel>], iteration_bounds = array<i64: 1>, scalar_prefetch = 0 : i64, scratch_operands = 0 : i64, tpu.core_type = #tpu.core_type<tc>, window_params = [{transform_indices = @transform_0, window_bounds = array<i64: 8, 32>}, {pipeline_mode = #tpu.pipeline_mode<synchronous>, transform_indices = @transform_1, window_bounds = array<i64: 32, 32>}, {pipeline_mode = #tpu.pipeline_mode<synchronous>, transform_indices = @transform_2, window_bounds = array<i64: 1, 32>}, {pipeline_mode = #tpu.pipeline_mode<synchronous>, transform_indices = @transform_3, window_bounds = array<i64: 128, 32>}, {pipeline_mode = #tpu.pipeline_mode<synchronous>, transform_indices = @transform_4, window_bounds = array<i64: 1, 128>}, {transform_indices = @transform_5, window_bounds = array<i64: 8, 128>}]} {
    %c0 = arith.constant 0 : index
    %c0_0 = arith.constant 0 : index
    %0 = vector.load %arg1[%c0, %c0_0] : memref<8x32xf32, #tpu.memory_space<vmem>>, vector<8x32xf32>
    %c0_1 = arith.constant 0 : index
    %c0_2 = arith.constant 0 : index
    %1 = vector.load %arg2[%c0_1, %c0_2] : memref<32x32xf32, #tpu.memory_space<vmem>>, vector<32x32xf32>
    %c0_3 = arith.constant 0 : index
    %c0_4 = arith.constant 0 : index
    %2 = vector.load %arg4[%c0_3, %c0_4] : memref<128x32xf32, #tpu.memory_space<vmem>>, vector<128x32xf32>
    %cst = arith.constant dense<0.000000e+00> : vector<8x32xf32>
    %3 = tpu.matmul %0, %1, %cst {dimension_numbers = #tpu.dot_dimension_numbers<[1], [1], [0], [0], [0, 0, 1, 0], [], []>} : vector<8x32xf32>, vector<32x32xf32>, vector<8x32xf32> -> vector<8x32xf32>
    %c0_5 = arith.constant 0 : index
    %c0_6 = arith.constant 0 : index
    %4 = vector.load %arg3[%c0_5, %c0_6] : memref<1x32xf32, #tpu.memory_space<vmem>>, vector<1x32xf32>
    %5 = vector.broadcast %4 : vector<1x32xf32> to vector<8x32xf32>
    %6 = arith.addf %3, %5 : vector<8x32xf32>
    %cst_7 = arith.constant 0.000000e+00 : f32
    %7 = vector.broadcast %cst_7 : f32 to vector<8x32xf32>
    %8 = arith.maximumf %6, %7 : vector<8x32xf32>
    %cst_8 = arith.constant dense<0.000000e+00> : vector<8x128xf32>
    %9 = tpu.matmul %8, %2, %cst_8 {dimension_numbers = #tpu.dot_dimension_numbers<[1], [1], [0], [0], [0, 0, 1, 0], [], []>} : vector<8x32xf32>, vector<128x32xf32>, vector<8x128xf32> -> vector<8x128xf32>
    %c0_9 = arith.constant 0 : index
    %c0_10 = arith.constant 0 : index
    %10 = vector.load %arg5[%c0_9, %c0_10] : memref<1x128xf32, #tpu.memory_space<vmem>>, vector<1x128xf32>
    %11 = vector.broadcast %10 : vector<1x128xf32> to vector<8x128xf32>
    %12 = arith.addf %9, %11 : vector<8x128xf32>
    %c0_11 = arith.constant 0 : index
    %c0_12 = arith.constant 0 : index
    %13 = vector.load %arg6[%c0_11, %c0_12] : memref<8x128xf32, #tpu.memory_space<vmem>>, vector<8x128xf32>
    tpu.vector_store %arg6[%c0_11, %c0_12], %12 {strides = array<i32>} : memref<8x128xf32, #tpu.memory_space<vmem>>, vector<8x128xf32>,
    return
  }
  func.func @transform_0(%arg0: i32) -> (i32, i32) {
    %c0_i32 = arith.constant 0 : i32
    %c0_i32_0 = arith.constant 0 : i32
    return %arg0, %c0_i32 : i32, i32
  }
  func.func @transform_1(%arg0: i32) -> (i32, i32) {
    %c0_i32 = arith.constant 0 : i32
    %c0_i32_0 = arith.constant 0 : i32
    %c0_i32_1 = arith.constant 0 : i32
    return %c0_i32, %c0_i32_0 : i32, i32
  }
  func.func @transform_2(%arg0: i32) -> (i32, i32) {
    %c0_i32 = arith.constant 0 : i32
    %c0_i32_0 = arith.constant 0 : i32
    %c0_i32_1 = arith.constant 0 : i32
    return %c0_i32, %c0_i32_0 : i32, i32
  }
  func.func @transform_3(%arg0: i32) -> (i32, i32) {
    %c0_i32 = arith.constant 0 : i32
    %c0_i32_0 = arith.constant 0 : i32
    %c0_i32_1 = arith.constant 0 : i32
    return %c0_i32, %c0_i32_0 : i32, i32
  }
  func.func @transform_4(%arg0: i32) -> (i32, i32) {
    %c0_i32 = arith.constant 0 : i32
    %c0_i32_0 = arith.constant 0 : i32
    %c0_i32_1 = arith.constant 0 : i32
    return %c0_i32, %c0_i32_0 : i32, i32
  }
  func.func @transform_5(%arg0: i32) -> (i32, i32) {
    %c0_i32 = arith.constant 0 : i32
    %c0_i32_0 = arith.constant 0 : i32
    return %arg0, %c0_i32 : i32, i32
  }
}

</mosaic_0001>

<bundles_post_ra>
// kernel: tpu_custom_call.1
= control target key start
LH: loop header
LB: loop body
LE: loop exit
PB: predicated region body
PF: predicated region fallthrough
CT: control target
= control target key end

     0   :  { %vm49_vm0 = vcmask 261120   ;;  %v439_v2 = vmov 0.0|0.0   ;;  %vm440_vm2 = vmmov 0   ;;  %v441_v5 = vmov 0.0   ;;  %s582_s0 = inlined_call_operand.vmem [shape: f32[8,32], index: 0, kind: input, shape index: {}]   ;;  %s583_s1 = inlined_call_operand.vmem [shape: f32[32,32], index: 1, kind: input, shape index: {}]   ;;  %s584_s2 = inlined_call_operand.vmem [shape: f32[1,32], index: 2, kind: input, shape index: {}]   ;;  %s585_s3 = inlined_call_operand.vmem [shape: f32[128,32], index: 3, kind: input, shape index: {}]   ;;  %s586_s4 = inlined_call_operand.vmem [shape: f32[1,128], index: 4, kind: input, shape index: {}]   ;;  %s587_s5 = inlined_call_operand.hbm [shape: f32[8,128], index: 5, kind: output, shape index: {}]  }
   0x1   :  { %v22_v0 = vld [vmem:[%s583_s1] sm:$0xff]  ;;  %v23_v1 = vld [vmem:[%s583_s1 + $0x8] sm:$0xff]  ;;  %371 = vmatprep.subr.bf16.mxu0 %v439_v2  ;;  %vm481_vm1 = vmpackc.low %vm49_vm0, %vm49_vm0  ;;  %379 = vmatprep.subr.bf16.mxu1 %v439_v2 }
   0x2   :  { %v372_v3 = vpack.c.bf16 %v23_v1, %v22_v0  ;;  %333 = vmatprep.mubr.msk.f32.mxu0 %vm440_vm2, %v441_v5  ;;  %v26_v6 = vld [vmem:[%s585_s3] sm:$0xff]  ;;  %v27_v7 = vld [vmem:[%s585_s3 + $0x8] sm:$0xff]  ;;  %368 = vmatprep.mubr.msk.f32.mxu1 %vm440_vm2, %v441_v5  ;;  %v24_v9 = vld [vmem:[%s583_s1 + $0x10] sm:$0xff] }
   0x3   :  { %v380_v8 = vpack.c.bf16 %v27_v7, %v26_v6  ;;  %v25_v10 = vld [vmem:[%s583_s1 + $0x18] sm:$0xff]  ;;  %v28_v11 = vld [vmem:[%s585_s3 + $0x10] sm:$0xff] }
   0x4   :  { %374 = vmatpush3.bf16.xpose.msk.msra.mxu0 %vm481_vm1, %v372_v3  ;;  %v29_v12 = vld [vmem:[%s585_s3 + $0x18] sm:$0xff]  ;;  %v376_v13 = vpack.c.bf16 %v25_v10, %v24_v9 }
   0x5   :  { %375 = vmatprep.subr.bf16.mxu0 %v439_v2  ;;  %382 = vmatpush3.bf16.xpose.msk.msra.mxu1 %vm481_vm1, %v380_v8 }
   0x6   :  { %383 = vmatprep.subr.bf16.mxu1 %v439_v2 }
   0x7   :  { %10 = vsyncpa [#allocation3], 0  ;;  %v384_v14 = vpack.c.bf16 %v29_v12, %v28_v11  ;;  %v30_v15 = vld [vmem:[%s585_s3 + $0x20] sm:$0xff]  ;;  %v31_v16 = vld [vmem:[%s585_s3 + $0x28] sm:$0xff]  ;;  %s442_s11 = smov [#allocation2]  }
   0x8   :  { %v21_v17 = vld [vmem:[%s582_s0] sm:$0xff]  ;;  %v388_v18 = vpack.c.bf16 %v31_v16, %v30_v15  ;;  %v32_v19 = vld [vmem:[%s585_s3 + $0x30] sm:$0xff]  ;;  %v33_v20 = vld [vmem:[%s585_s3 + $0x38] sm:$0xff] }
   0x9   :  { %v392_v21 = vpack.c.bf16 %v33_v20, %v32_v19  ;;  %v34_v22 = vld [vmem:[%s585_s3 + $0x40] sm:$0xff]  ;;  %v35_v23 = vld [vmem:[%s585_s3 + $0x48] sm:$0xff]  ;;  %v36_v25 = vld [vmem:[%s585_s3 + $0x50] sm:$0xff] }
   0xa   :  { %v396_v24 = vpack.c.bf16 %v35_v23, %v34_v22  ;;  %v37_v26 = vld [vmem:[%s585_s3 + $0x58] sm:$0xff]  ;;  %v38_v28 = vld [vmem:[%s585_s3 + $0x60] sm:$0xff]  ;;  %v39_v29 = vld [vmem:[%s585_s3 + $0x68] sm:$0xff] }
   0xb   :  { %v400_v27 = vpack.c.bf16 %v37_v26, %v36_v25  ;;  %v404_v30 = vpack.c.bf16 %v39_v29, %v38_v28  ;;  %v40_v31 = vld [vmem:[%s585_s3 + $0x70] sm:$0xff]  ;;  %v41_v32 = vld [vmem:[%s585_s3 + $0x78] sm:$0xff]  ;;  %v279_v34 = vld [vmem:[%s584_s2] ss:$0 sm:$0xff]  ;;  %s271_s3 = sshll.u32 %s442_s11, 4  ;;  %s272_s3 = int_to_ptr.vmem [resolvable:$true] %s271_s3 }
   0xc   :  { %378 = vmatpush3.bf16.xpose.msk.msra.mxu0 %vm481_vm1, %v376_v13  ;;  %v408_v33 = vpack.c.bf16 %v41_v32, %v40_v31  ;;  %v285_v39 = vld [vmem:[%s586_s4] ss:$0 sm:$0xff]  ;;  %s415_s12 = scalar_lea.vmem %s272_s3, 128  ;;  %p420_p1 = scmp.lt.s32.totalorder %s272_s3, %s272_s3 }
   0xd   :  { %386 = vmatpush3.bf16.xpose.msk.msra.mxu1 %vm481_vm1, %v384_v14  ;;  %p416_p0 = scmp.ne.s32.totalorder %s272_s3, %s415_s12  ;;  %p421_p2 = scmp.lt.s32.totalorder %s415_s12, %s415_s12 }
   0xe   :  { %387 = vmatprep.subr.bf16.mxu1 %v439_v2 }
   0xf   :  { %p422_p3 = por %p421_p2, %p420_p1 }
  0x11   :  { %p423_p4 = pnand %p422_p3, %p416_p0 }
  0x13   :  { %334 = vmatmul.mubr.msk.f32.vlgmr.msra.gmra.mrb[0].mxu0 %vm49_vm0, %v21_v17 }
  0x15   :  { %390 = vmatpush3.bf16.xpose.msk.msra.mxu1 %vm481_vm1, %v388_v18 }
  0x16   :  { %391 = vmatprep.subr.bf16.mxu1 %v439_v2 }
  0x1d   :  { %394 = vmatpush3.bf16.xpose.msk.msra.mxu1 %vm481_vm1, %v392_v21 }
  0x1e   :  { %395 = vmatprep.subr.bf16.mxu1 %v439_v2 }
  0x25   :  { %398 = vmatpush3.bf16.xpose.msk.msra.mxu1 %vm481_vm1, %v396_v24 }
  0x26   :  { %399 = vmatprep.subr.bf16.mxu1 %v439_v2 }
  0x2d   :  { %402 = vmatpush3.bf16.xpose.msk.msra.mxu1 %vm481_vm1, %v400_v27 }
  0x2e   :  { %403 = vmatprep.subr.bf16.mxu1 %v439_v2 }
  0x35   :  { %406 = vmatpush3.bf16.xpose.msk.msra.mxu1 %vm481_vm1, %v404_v30 }
  0x36   :  { %407 = vmatprep.subr.bf16.mxu1 %v439_v2 }
  0x3d   :  { %410 = vmatpush3.bf16.xpose.msk.msra.mxu1 %vm481_vm1, %v408_v33 }
  0xe6   :  { %v131_v35 = vpop.f32.mrb[0].mxu0 }
  0xe7   :  { %v132_v36 = vadd.f32 %v279_v34, %v131_v35  ;;  %v335_v37 = vpop.f32.mrb[1].mxu0 }
  0xe9   :  { %v135_v38 = vmax.f32 %v132_v36, 0.0 }
  0xeb   :  { %369 = vmatmul.mubr.msk.f32.vlgmr.msra.gmra.mrb[0].mxu1 %vm49_vm0, %v135_v38 }
 0x1be   :  { %v260_v40 = vpop.f32.mrb[0].mxu1 }
 0x1bf   :  { %v261_v41 = vadd.f32 %v285_v39, %v260_v40  ;;  %v370_v42 = vpop.f32.mrb[1].mxu1 }
 0x1c1   :  { %264 = vst [vmem:[#allocation2] sm:$0xff] %v261_v41 }
 0x1c2   :  { %426 = shalt.err (!%p423_p4)
}
 0x1c3   :  { %s427_s14 = scalar_lea.hbm %s587_s5, 128 }
 0x1c4   :  { %p428_p5 = scmp.ne.s32.totalorder %s587_s5, %s427_s14  ;;  %p431_p6 = scmp.lt.u32.totalorder %s427_s14, %s587_s5 }
 0x1c6   :  { %p433_p7 = pnand %p431_p6, %p428_p5 }
 0x1c8   :  { %436 = shalt.err (!%p433_p7)
}
 0x1c9   :  { %274 = dma.vmem_to_hbm [thread:$0]  %s272_s3, 128, %s587_s5, [#allocation3]  }
 0x1ca   :  { %437 = dma.done.wait [#allocation3], 128  }
 0x1cb   :  { %438 = vsyncadd [#allocation3], 4294967168 }
 0x1cc   :  { %278 = vsyncpa [#allocation3], 1 }

</bundles_post_ra>
